<compile_context>
chip_gen: v6e
topology: v6e:2x2x1
jax: 0.10.0
libtpu: 0.0.40
codegen_flags: <defaults>
</compile_context>

<pallas_src>
import math

import jax
import jax.numpy as jnp
from jax.experimental import pallas as pl
from jax.experimental.pallas import tpu as pltpu


def _add_pos_kernel(x_ref, pe_ref, o_ref):
    # x_ref / o_ref : (tS, B*E)  -- batch collapsed into the lane axis
    # pe_ref        : (tS, E)    -- one positional row per sequence row
    E = pe_ref.shape[-1]
    B = x_ref.shape[-1] // E
    pe = pe_ref[...]
    # Static unroll over the B groups of E lanes; every slice offset is a
    # compile-time constant.  For real model sizes (E a multiple of 128) each
    # load/add/store is a full, unmasked lane-aligned vector op.
    for b in range(B):
        sl = slice(b * E, (b + 1) * E)
        o_ref[:, sl] = x_ref[:, sl] + pe


def make_pos_embedding(emb_size: int, maxlen: int = 5000,
                       dtype=jnp.float32) -> jnp.ndarray:
    """Replicates the PyTorch buffer construction exactly (plain JAX glue)."""
    assert emb_size % 2 == 0, "emb_size must be even (same assumption as the PyTorch module)"
    den = jnp.exp(-jnp.arange(0, emb_size, 2, dtype=jnp.float32)
                  * math.log(10000.0) / emb_size)                      # (E/2,)
    pos = jnp.arange(0, maxlen, dtype=jnp.float32).reshape(maxlen, 1)  # (L, 1)
    pe = jnp.zeros((maxlen, emb_size), dtype=jnp.float32)
    pe = pe.at[:, 0::2].set(jnp.sin(pos * den))
    pe = pe.at[:, 1::2].set(jnp.cos(pos * den))
    # Cast once at buffer-build time so the in-kernel add runs in the model
    # dtype (halves pe HBM traffic for bf16 models).
    return pe[:, None, :].astype(dtype)  # (maxlen, 1, emb_size)


def _round_up(x: int, m: int) -> int:
    return ((x + m - 1) // m) * m


def positional_encoding_forward(token_embedding: jnp.ndarray,
                                pos_embedding: jnp.ndarray,
                                dropout_p: float = 0.1,
                                training: bool = False) -> jnp.ndarray:
    """token_embedding: (S, B, E); pos_embedding: (maxlen, 1, E)."""
    S, B, E = token_embedding.shape
    maxlen = pos_embedding.shape[0]
    assert S <= maxlen, "sequence longer than positional-encoding buffer"

    dtype = token_embedding.dtype
    itemsize = jnp.dtype(dtype).itemsize

    # Free (contiguous) reshapes: collapse (B, E) into one dense lane axis and
    # squeeze the broadcast dim out of pe.  No wrapper-side slice of pe -- the
    # BlockSpec below windows directly into the full buffer.
    x2d = token_embedding.reshape(S, B * E)
    pe2d = pos_embedding.reshape(maxlen, E)
    if pe2d.dtype != dtype:
        pe2d = pe2d.astype(dtype)

    # Tile rows over the sequence axis.  Budget the double-buffered footprint
    # (2 x (x_tile + out_tile + pe_tile)) to ~16 MiB, which leaves headroom on
    # every generation (v5e/v6e 128 MiB, v7x 64 MiB VMEM per TensorCore).
    vmem_budget = 16 * 1024 * 1024
    bytes_per_row = 2 * (2 * B * E + E) * itemsize
    tS = max(1, vmem_budget // bytes_per_row)
    tS = max(8, (tS // 8) * 8)          # keep the sublane dim a multiple of 8
    tS = min(tS, _round_up(S, 8))       # never bigger than the (padded) seq

    grid = (pl.cdiv(S, tS),)

    out2d = pl.pallas_call(
        _add_pos_kernel,
        out_shape=jax.ShapeDtypeStruct((S, B * E), dtype),
        grid_spec=pltpu.PrefetchScalarGridSpec(
            num_scalar_prefetch=0,
            grid=grid,
            in_specs=[
                pl.BlockSpec((tS, B * E), lambda i: (i, 0)),   # x tile
                pl.BlockSpec((tS, E), lambda i: (i, 0)),       # pe tile (walks
                                                               # first S/tS blocks
                                                               # of the full buffer)
            ],
            out_specs=pl.BlockSpec((tS, B * E), lambda i: (i, 0)),
        ),
        compiler_params=pltpu.CompilerParams(
            # Pure elementwise add: no cross-iteration carry, so the sequence
            # axis is parallel (lets v7x shard the grid across both TCs).
            dimension_semantics=("parallel",),
            vmem_limit_bytes=32 * 1024 * 1024,
        ),
    )(x2d, pe2d)

    # nn.Dropout in eval mode is identity; training-mode mask not applied here.
    del dropout_p, training
    return out2d.reshape(S, B, E)


if __name__ == "__main__":
    key = jax.random.PRNGKey(0)

    seq_len, batch, emb_size = 8, 2, 32
    maxlen = 64  # small maxlen; only first seq_len rows are used

    x = jax.random.normal(key, (seq_len, batch, emb_size), dtype=jnp.float32)
    pos_embedding = make_pos_embedding(emb_size, maxlen)

    out = positional_encoding_forward(x, pos_embedding, dropout_p=0.1,
                                      training=False)
    out = jax.block_until_ready(out)

    # sanity check against pure-JAX reference
    ref = x + pos_embedding[:seq_len]
    assert out.shape == (seq_len, batch, emb_size)
    assert jnp.allclose(out, ref, atol=1e-6), "mismatch vs reference"

    print("KERNEL_OK")
</pallas_src>

<mosaic_0001>
module attributes {stable_mosaic.version = 11 : i64} {
  func.func @_add_pos_kernel(%arg0: i32, %arg1: memref<8x64xf32, #tpu.memory_space<vmem>>, %arg2: memref<8x32xf32, #tpu.memory_space<vmem>>, %arg3: memref<8x64xf32, #tpu.memory_space<vmem>>) attributes {dimension_semantics = [#tpu.dimension_semantics<parallel>], iteration_bounds = array<i64: 1>, scalar_prefetch = 0 : i64, scratch_operands = 0 : i64, tpu.core_type = #tpu.core_type<tc>, window_params = [{transform_indices = @transform_0, window_bounds = array<i64: 8, 64>}, {transform_indices = @transform_1, window_bounds = array<i64: 8, 32>}, {transform_indices = @transform_2, window_bounds = array<i64: 8, 64>}]} {
    %c0 = arith.constant 0 : index
    %c0_0 = arith.constant 0 : index
    %0 = vector.load %arg2[%c0, %c0_0] : memref<8x32xf32, #tpu.memory_space<vmem>>, vector<8x32xf32>
    %c0_1 = arith.constant 0 : index
    %c0_2 = arith.constant 0 : index
    %1 = vector.load %arg1[%c0_1, %c0_2] : memref<8x64xf32, #tpu.memory_space<vmem>>, vector<8x32xf32>
    %2 = arith.addf %1, %0 : vector<8x32xf32>
    %c0_3 = arith.constant 0 : index
    %c0_4 = arith.constant 0 : index
    %3 = vector.load %arg3[%c0_3, %c0_4] : memref<8x64xf32, #tpu.memory_space<vmem>>, vector<8x32xf32>
    tpu.vector_store %arg3[%c0_3, %c0_4], %2 {strides = array<i32>} : memref<8x64xf32, #tpu.memory_space<vmem>>, vector<8x32xf32>,
    %c0_5 = arith.constant 0 : index
    %c32 = arith.constant 32 : index
    %4 = vector.load %arg1[%c0_5, %c32] : memref<8x64xf32, #tpu.memory_space<vmem>>, vector<8x32xf32>
    %5 = arith.addf %4, %0 : vector<8x32xf32>
    %c0_6 = arith.constant 0 : index
    %c32_7 = arith.constant 32 : index
    %6 = vector.load %arg3[%c0_6, %c32_7] : memref<8x64xf32, #tpu.memory_space<vmem>>, vector<8x32xf32>
    tpu.vector_store %arg3[%c0_6, %c32_7], %5 {strides = array<i32>} : memref<8x64xf32, #tpu.memory_space<vmem>>, vector<8x32xf32>,
    return
  }
  func.func @transform_0(%arg0: i32) -> (i32, i32) {
    %c0_i32 = arith.constant 0 : i32
    %c0_i32_0 = arith.constant 0 : i32
    return %arg0, %c0_i32 : i32, i32
  }
  func.func @transform_1(%arg0: i32) -> (i32, i32) {
    %c0_i32 = arith.constant 0 : i32
    %c0_i32_0 = arith.constant 0 : i32
    return %arg0, %c0_i32 : i32, i32
  }
  func.func @transform_2(%arg0: i32) -> (i32, i32) {
    %c0_i32 = arith.constant 0 : i32
    %c0_i32_0 = arith.constant 0 : i32
    return %arg0, %c0_i32 : i32, i32
  }
}

</mosaic_0001>

<bundles_post_ra>
// kernel: tpu_custom_call.1
= control target key start
LH: loop header
LB: loop body
LE: loop exit
PB: predicated region body
PF: predicated region fallthrough
CT: control target
= control target key end

     0   :  { %vm15_vm0 = vcmask 261120   ;;  %s89_s0 = inlined_call_operand.vmem [shape: f32[8,64], index: 0, kind: input, shape index: {}]   ;;  %s90_s1 = inlined_call_operand.vmem [shape: f32[64,32], index: 1, kind: input, shape index: {}]   ;;  %s91_s2 = inlined_call_operand.hbm [shape: f32[8,64], index: 2, kind: output, shape index: {}]  }
   0x1   :  { %v12_v0 = vld [vmem:[%s90_s1] sm:$0xff] }
   0x2   :  { %v13_v1 = vld [vmem:[%s89_s0] sm:$0xff] }
   0x3   :  { %7 = vsyncpa [#allocation3], 0  ;;  %v14_v2 = vadd.f32 %v13_v1, %v12_v0  ;;  %s63_s13 = smov 32   ;;  %s64_s14 = smov [#allocation2]   ;;  %vm23_vm1 = vcmask 523520  }
   0x4   :  { %19 = vrot.lane.b32.xlu0 %v12_v0, %s63_s13  ;;  %s31_s15 = sshll.u32 %s64_s14, 4  ;;  %s32_s15 = int_to_ptr.vmem [resolvable:$true] %s31_s15 }
   0x5   :  { %16 = vst.msk [vmem:[#allocation2] sm:$0xff] %vm15_vm0, %v14_v2  ;;  %s41_s16 = scalar_lea.vmem %s32_s15, 128  ;;  %p46_p1 = scmp.lt.s32.totalorder %s32_s15, %s32_s15 }
   0x6   :  { %p42_p0 = scmp.ne.s32.totalorder %s32_s15, %s41_s16  ;;  %p47_p2 = scmp.lt.s32.totalorder %s41_s16, %s41_s16 }
   0x8   :  { %p48_p3 = por %p47_p2, %p46_p1 }
   0xa   :  { %p49_p4 = pnand %p48_p3, %p42_p0 }
  0x76   :  { %v20_v3 = vpop.permute.xlu0 %19 }
  0x77   :  { %v22_v4 = vadd.f32 %v20_v3, %v13_v1 }
  0x79   :  { %24 = vst.msk [vmem:[#allocation2] sm:$0xff] %vm23_vm1, %v22_v4 }
  0x7a   :  { %52 = shalt.err (!%p49_p4)
}
  0x7b   :  { %34 = dma.vmem_to_hbm [thread:$0]  %s32_s15, 128, %s91_s2, [#allocation3]  }
  0x7c   :  { %61 = dma.done.wait [#allocation3], 128  }
  0x7d   :  { %62 = vsyncadd [#allocation3], 4294967168 }
  0x7e   :  { %38 = vsyncpa [#allocation3], 1 }

</bundles_post_ra>
